<compile_context>
chip_gen: v6e
topology: v6e:2x2x1
jax: 0.10.0
libtpu: 0.0.40
codegen_flags: <defaults>
</compile_context>

<pallas_src>
import numpy as np
import jax
import jax.numpy as jnp
from jax.experimental import pallas as pl
from jax.experimental.pallas import tpu as pltpu

EPS = 1e-12


# --------------------------------------------------------------------------
# Init-time geometry (faithful port of tt_2sensors.__build, numpy, host-side)
# --------------------------------------------------------------------------
def build_tt(sensors, img_size):
    sensors = np.asarray(sensors, dtype=np.float32)
    x1, y1 = sensors[0, 0], sensors[0, 1]
    x2, y2 = sensors[1, 0], sensors[1, 1]
    slope = (y2 - y1) / (x2 - x1)
    per_pixel_width = np.float32(1.0 / img_size)
    n_pts_x = int(abs(x2 - x1) / per_pixel_width)   # trunc toward zero, like .type(torch.int)
    n_pts_y = int(abs(y2 - y1) / per_pixel_width)

    intersect_vert = None
    intersect_horz = None
    if n_pts_x > 0:
        xs = x1 + np.arange(1, n_pts_x + 1, dtype=np.float32) * per_pixel_width * np.sign(x2 - x1)
        ys = y2 - slope * (x2 - xs)
        intersect_vert = np.stack((xs, ys), axis=-1)
    if n_pts_y > 0:
        ys = y1 + np.arange(1, n_pts_y + 1, dtype=np.float32) * per_pixel_width * np.sign(y2 - y1)
        xs = x2 - (y2 - ys) / slope
        intersect_horz = np.stack((xs, ys), axis=-1)

    all_pts = sensors.copy()
    if intersect_horz is not None:
        all_pts = np.concatenate((sensors, intersect_horz), axis=0)
    if intersect_vert is not None:
        all_pts = np.concatenate((all_pts, intersect_vert), axis=0)

    order = np.argsort(all_pts[:, 0])          # torch.argsort(all_pts, dim=0)[:, 0]
    all_pts = all_pts[order]

    midpoints = (all_pts[:-1] + all_pts[1:]) / 2.0
    lengths = np.linalg.norm(all_pts[:-1] - all_pts[1:], axis=-1).astype(np.float32)
    midpoints = np.clip((midpoints + 1.0) / 2.0, 0.0, 1.0 - EPS)
    pixel_idx = np.floor(midpoints / per_pixel_width).astype(np.int32)
    # EPS=1e-12 is below f32 resolution, so a midpoint exactly at 1.0 would
    # otherwise yield an out-of-range index (latent bug in the reference).
    pixel_idx = np.minimum(pixel_idx, img_size - 1)
    return lengths, pixel_idx


def build_weight_image(sensors, img_size):
    """Scatter-add segment lengths into a per-pixel weight image (init-time)."""
    lengths, pixel_idx = build_tt(sensors, img_size)
    w = np.zeros((img_size, img_size), dtype=np.float32)
    np.add.at(w, (pixel_idx[:, 0], pixel_idx[:, 1]), lengths)
    return w, lengths, pixel_idx


# --------------------------------------------------------------------------
# Pallas kernel: tiled weighted reduction  out = sum(img * w)
# --------------------------------------------------------------------------
def tt_kernel(img_ref, w_ref, out_ref):
    i = pl.program_id(0)

    @pl.when(i == 0)
    def _init():
        out_ref[...] = jnp.zeros_like(out_ref)

    # (TH, W) elementwise multiply + full reduction -> (1, 1) partial sum.
    out_ref[...] += jnp.sum(img_ref[...] * w_ref[...], keepdims=True)


def _pick_row_tile(H, W, itemsize=4, max_block_bytes=2 << 20):
    """Largest row tile that divides H, is a multiple of 8 (or == H), and
    keeps one block <= ~2 MiB (double-buffered by the pipeline)."""
    if H * W * itemsize <= max_block_bytes:
        return H
    best = None
    for t in range(8, H + 1, 8):
        if H % t == 0 and t * W * itemsize <= max_block_bytes:
            best = t
    return best if best is not None else H


def make_tt_forward(weights):
    """Build a jitted forward for a fixed weight image (fixed geometry)."""
    weights = jnp.asarray(weights, jnp.float32)
    H, W = weights.shape
    TH = _pick_row_tile(H, W)
    n_blocks = H // TH

    kernel_call = pl.pallas_call(
        tt_kernel,
        out_shape=jax.ShapeDtypeStruct((1, 1), jnp.float32),
        grid=(n_blocks,),
        in_specs=[
            pl.BlockSpec((TH, W), lambda i: (i, 0)),
            pl.BlockSpec((TH, W), lambda i: (i, 0)),
        ],
        out_specs=pl.BlockSpec((1, 1), lambda i: (0, 0)),  # resident accumulator
        compiler_params=pltpu.CompilerParams(
            dimension_semantics=("arbitrary",)),
    )

    @jax.jit
    def fwd(img):
        out = kernel_call(img.astype(jnp.float32), weights)
        return out[0, 0]

    return fwd


class TravelTime2Sensors:
    """JAX/Pallas equivalent of the PyTorch tt_2sensors module."""

    def __init__(self, sensors, img_size):
        w, lengths, pixel_idx = build_weight_image(sensors, img_size)
        self.weights = w                 # (H, W) f32, precomputed at init
        self.lengths = lengths           # kept for reference/debug
        self.pixel_idx = pixel_idx
        self._fwd = make_tt_forward(w)

    def __call__(self, img):
        return self._fwd(img)


# --------------------------------------------------------------------------
if __name__ == "__main__":
    img_size = 16
    sensors = np.array([[-0.9, -0.7],
                        [0.8, 0.5]], dtype=np.float32)

    module = TravelTime2Sensors(sensors, img_size)

    # deterministic input image
    key = jax.random.PRNGKey(0)
    img = jax.random.normal(key, (img_size, img_size), dtype=jnp.float32)

    result = module(img)
    result = jax.block_until_ready(result)

    # pure-numpy reference of the original forward pass (gather + weighted sum)
    img_np = np.asarray(img)
    ref = float(np.sum(img_np[module.pixel_idx[:, 0], module.pixel_idx[:, 1]]
                       * module.lengths))
    assert abs(float(result) - ref) < 1e-4, (float(result), ref)

    print("KERNEL_OK")
</pallas_src>

<mosaic_0001>
module attributes {stable_mosaic.version = 11 : i64} {
  func.func @tt_kernel(%arg0: i32, %arg1: memref<16x16xf32, #tpu.memory_space<vmem>>, %arg2: memref<16x16xf32, #tpu.memory_space<vmem>>, %arg3: memref<1x1xf32, #tpu.memory_space<vmem>>) attributes {dimension_semantics = [#tpu.dimension_semantics<arbitrary>], iteration_bounds = array<i64: 1>, scalar_prefetch = 0 : i64, scratch_operands = 0 : i64, tpu.core_type = #tpu.core_type<tc>, window_params = [{transform_indices = @transform_0, window_bounds = array<i64: 16, 16>}, {transform_indices = @transform_1, window_bounds = array<i64: 16, 16>}, {pipeline_mode = #tpu.pipeline_mode<synchronous>, transform_indices = @transform_2, window_bounds = array<i64: 1, 1>}]} {
    %c0_i32 = arith.constant 0 : i32
    %0 = arith.cmpi eq, %arg0, %c0_i32 : i32
    %1 = arith.extui %0 : i1 to i32
    %c0_i32_0 = arith.constant 0 : i32
    %2 = arith.cmpi ne, %1, %c0_i32_0 : i32
    scf.if %2 {
      %cst_8 = arith.constant 0.000000e+00 : f32
      %14 = vector.broadcast %cst_8 : f32 to vector<1x1xf32>
      %c0_9 = arith.constant 0 : index
      %c0_10 = arith.constant 0 : index
      %15 = vector.load %arg3[%c0_9, %c0_10] : memref<1x1xf32, #tpu.memory_space<vmem>>, vector<1x1xf32>
      tpu.vector_store %arg3[%c0_9, %c0_10], %14 {strides = array<i32>} : memref<1x1xf32, #tpu.memory_space<vmem>>, vector<1x1xf32>,
    } else {
    }
    %c0 = arith.constant 0 : index
    %c0_1 = arith.constant 0 : index
    %3 = vector.load %arg3[%c0, %c0_1] : memref<1x1xf32, #tpu.memory_space<vmem>>, vector<1x1xf32>
    %c0_2 = arith.constant 0 : index
    %c0_3 = arith.constant 0 : index
    %4 = vector.load %arg1[%c0_2, %c0_3] : memref<16x16xf32, #tpu.memory_space<vmem>>, vector<16x16xf32>
    %c0_4 = arith.constant 0 : index
    %c0_5 = arith.constant 0 : index
    %5 = vector.load %arg2[%c0_4, %c0_5] : memref<16x16xf32, #tpu.memory_space<vmem>>, vector<16x16xf32>
    %6 = arith.mulf %4, %5 : vector<16x16xf32>
    %7 = vector.shape_cast %6 : vector<16x16xf32> to vector<1x16x16xf32>
    %cst = arith.constant dense<0.000000e+00> : vector<1xf32>
    %8 = vector.multi_reduction <add>, %7, %cst [1, 2] : vector<1x16x16xf32> to vector<1xf32>
    %9 = vector.shape_cast %8 : vector<1xf32> to vector<1x1x1xf32>
    %10 = vector.extract %9[0, 0, 0] : f32 from vector<1x1x1xf32>
    %11 = vector.broadcast %10 : f32 to vector<1x1xf32>
    %12 = arith.addf %3, %11 : vector<1x1xf32>
    %c0_6 = arith.constant 0 : index
    %c0_7 = arith.constant 0 : index
    %13 = vector.load %arg3[%c0_6, %c0_7] : memref<1x1xf32, #tpu.memory_space<vmem>>, vector<1x1xf32>
    tpu.vector_store %arg3[%c0_6, %c0_7], %12 {strides = array<i32>} : memref<1x1xf32, #tpu.memory_space<vmem>>, vector<1x1xf32>,
    return
  }
  func.func @transform_0(%arg0: i32) -> (i32, i32) {
    %c0_i32 = arith.constant 0 : i32
    %c0_i32_0 = arith.constant 0 : i32
    return %arg0, %c0_i32 : i32, i32
  }
  func.func @transform_1(%arg0: i32) -> (i32, i32) {
    %c0_i32 = arith.constant 0 : i32
    %c0_i32_0 = arith.constant 0 : i32
    return %arg0, %c0_i32 : i32, i32
  }
  func.func @transform_2(%arg0: i32) -> (i32, i32) {
    %c0_i32 = arith.constant 0 : i32
    %c0_i32_0 = arith.constant 0 : i32
    %c0_i32_1 = arith.constant 0 : i32
    return %c0_i32, %c0_i32_0 : i32, i32
  }
}

</mosaic_0001>

<bundles_post_ra>
// kernel: fwd.1
= control target key start
LH: loop header
LB: loop body
LE: loop exit
PB: predicated region body
PF: predicated region fallthrough
CT: control target
= control target key end

     0   :  { %7 = vsyncpa [#allocation3], 0  ;;  %s192_s0 = inlined_call_operand.hbm [shape: f32[16,16], index: 0, kind: input, shape index: {}]   ;;  %s193_s1 = inlined_call_operand.hbm [shape: f32[16,16], index: 1, kind: input, shape index: {}]   ;;  %s194_s2 = inlined_call_operand.hbm [shape: f32[1,1], index: 2, kind: output, shape index: {}]  }
   0x1   :  { %8 = vsyncpa [#allocation6], 0 }
   0x2   :  { %9 = vsyncpa [#allocation4], 0  ;;  %s160_s9 = smov [#allocation2]  }
   0x3   :  { %s15_s10 = sshll.u32 %s160_s9, 4  ;;  %s16_s10 = int_to_ptr.vmem [resolvable:$true] %s15_s10 }
   0x4   :  { %s102_s11 = scalar_lea.vmem %s16_s10, 256  ;;  %p107_p1 = scmp.lt.s32.totalorder %s16_s10, %s16_s10 }
   0x5   :  { %p103_p0 = scmp.ne.s32.totalorder %s16_s10, %s102_s11  ;;  %p108_p2 = scmp.lt.s32.totalorder %s102_s11, %s102_s11 }
   0x7   :  { %p109_p3 = por %p108_p2, %p107_p1 }
   0x9   :  { %p110_p4 = pnand %p109_p3, %p103_p0 }
   0xb   :  { %113 = shalt.err (!%p110_p4)
}
   0xc   :  { %s161_s12 = smov 128   ;;  %s162_s13 = smov 8  }
   0xd   :  { %21 = dma.hbm_to_vmem [thread:$0]  %s192_s0, 256, %s16_s10, [#allocation3], %s161_s12, %s161_s12, %s162_s13  }
   0xe   :  { %s163_s16 = smov [#allocation5]  }
   0xf   :  { %s27_s17 = sshll.u32 %s163_s16, 4  ;;  %s28_s17 = int_to_ptr.vmem [resolvable:$true] %s27_s17 }
  0x10   :  { %s122_s18 = scalar_lea.vmem %s28_s17, 256  ;;  %p127_p6 = scmp.lt.s32.totalorder %s28_s17, %s28_s17 }
  0x11   :  { %p123_p5 = scmp.ne.s32.totalorder %s28_s17, %s122_s18  ;;  %p128_p7 = scmp.lt.s32.totalorder %s122_s18, %s122_s18 }
  0x13   :  { %p129_p8 = por %p128_p7, %p127_p6 }
  0x15   :  { %p130_p9 = pnand %p129_p8, %p123_p5 }
  0x17   :  { %133 = shalt.err (!%p130_p9)
}
  0x18   :  { %33 = dma.hbm_to_vmem [thread:$0]  %s193_s1, 256, %s28_s17, [#allocation6], %s161_s12, %s161_s12, %s162_s13  }
  0x19   :  { %154 = dma.done.wait [#allocation3], 256  }
  0x1a   :  { %155 = vsyncadd [#allocation3], 4294967040 }
  0x1b   :  { %156 = dma.done.wait [#allocation6], 256  }
  0x1c   :  { %157 = vsyncadd [#allocation6], 4294967040  ;;  %vm44_vm0 = vcmask 0   ;;  %v164_v0 = vmov 0.0   ;;  %v47_v1 = vld [vmem:[#allocation2] sm:$0xff]  ;;  %v48_v2 = vld [vmem:[#allocation2 + $0x8] sm:$0xff] }
  0x1d   :  { %45 = vst.msk [vmem:[#allocation7] sm:$0x1] %vm44_vm0, %v164_v0  ;;  %v49_v3 = vld [vmem:[#allocation5] sm:$0xff]  ;;  %vm53_vm1 = vcmask 130048   ;;  %v50_v4 = vld [vmem:[#allocation5 + $0x8] sm:$0xff]  ;;  %s165_s0 = smov [#allocation7]  }
  0x1e   :  { %v51_v5 = vmul.f32 %v49_v3, %v47_v1  ;;  %v52_v6 = vmul.f32 %v50_v4, %v48_v2  ;;  %s76_s1 = sshll.u32 %s165_s0, 4  ;;  %s77_s1 = int_to_ptr.vmem [resolvable:$true] %s76_s1 }
  0x1f   :  { %s134_s22 = scalar_lea.vmem %s77_s1, 16  ;;  %s138_s23 = scalar_lea.vmem %s77_s1, 32 }
  0x20   :  { %v54_v7 = vsel %vm53_vm1, %v51_v5, 0.0  ;;  %v55_v8 = vsel %vm53_vm1, %v52_v6, 0.0  ;;  %p135_p10 = scmp.ne.s32.totalorder %s77_s1, %s134_s22  ;;  %p139_p11 = scmp.lt.s32.totalorder %s77_s1, %s77_s1 }
  0x21   :  { %v56_v9 = vadd.f32 %v55_v8, %v54_v7  ;;  %p140_p12 = scmp.lt.s32.totalorder %s138_s23, %s134_s22 }
  0x23   :  { %57 = vadd.xlane.f32.xlu0 %v56_v9  ;;  %p141_p13 = por %p140_p12, %p139_p11 }
  0x24   :  { %v46_v17 = vld [vmem:[#allocation7] sm:$0x1] }
  0x25   :  { %p142_p0 = pnand %p141_p13, %p135_p10 }
  0xac   :  { %v58_v10 = vpop.xlane.xlu0 %57 }
  0xad   :  { %v59_v11 = vrot.slane %v58_v10, 4 }
  0xaf   :  { %v60_v12 = vadd.f32 %v59_v11, %v58_v10 }
  0xb1   :  { %v61_v13 = vrot.slane %v60_v12, 2 }
  0xb3   :  { %v62_v14 = vadd.f32 %v61_v13, %v60_v12 }
  0xb5   :  { %v63_v15 = vrot.slane %v62_v14, 1 }
  0xb7   :  { %v64_v16 = vadd.f32 %v63_v15, %v62_v14 }
  0xb9   :  { %86 = vpush %v64_v16 }
  0xea   :  { %s87_s21 = spop %86 }
  0xeb   :  { %v66_v18 = vstv %s87_s21 }
  0xec   :  { %v67_v19 = vadd.f32 %v66_v18, %v46_v17 }
  0xee   :  { %69 = vst.msk [vmem:[#allocation7] sm:$0x1] %vm44_vm0, %v67_v19 }
  0xef   :  { %145 = shalt.err (!%p142_p0)
}
  0xf0   :  { %79 = dma.vmem_to_hbm [thread:$0]  %s77_s1, 16, %s194_s2, [#allocation4]  }
  0xf1   :  { %158 = dma.done.wait [#allocation4], 16  }
  0xf2   :  { %159 = vsyncadd [#allocation4], 4294967280 }
  0xf3   :  { %83 = vsyncpa [#allocation3], 1 }
  0xf4   :  { %84 = vsyncpa [#allocation6], 1 }
  0xf5   :  { %85 = vsyncpa [#allocation4], 1 }

</bundles_post_ra>
